<compile_context>
chip_gen: v5e
topology: v5e:2x2
jax: 0.10.0
libtpu: 0.0.40
codegen_flags: <defaults>
</compile_context>

<pallas_src>
import functools
import math

import jax
import jax.numpy as jnp
from jax import lax
from jax.experimental import pallas as pl
from jax.experimental.pallas import tpu as pltpu


# ---------------------------------------------------------------------------
# Wavelet generating functions (standard WaveletKernelNet definitions for the
# Laplace / Mexh / Morlet modules referenced by dfw_unit_2).
# ---------------------------------------------------------------------------
def laplace(p):
    A, ep, tal, f = 0.08, 0.03, 0.1, 50.0
    w = 2.0 * math.pi * f
    q = 1.0 - ep * ep
    return A * jnp.exp((-ep / math.sqrt(q)) * (w * (p - tal))) * (-jnp.sin(w * (p - tal)))


def mexh(p):
    return (1.0 - p ** 2) * jnp.exp(-(p ** 2) / 2.0)


def morlet(p):
    C = math.pi ** 0.25
    return C * jnp.exp(-(p ** 2) / 2.0) * jnp.cos(2.0 * math.pi * p)


# ---------------------------------------------------------------------------
# Parameter construction (mirrors dfw_unit_2.__init__ / the filter build at
# the top of forward()).  Pure glue -> plain JAX.
# ---------------------------------------------------------------------------
def build_dfw_unit_2(wave_choose, out_channels, real_cout, kernel_size, key):
    ks = kernel_size - 1
    if kernel_size % 2 == 0:
        ks += 1
    time_step_L = jnp.linspace(0.0, 1.0, int(ks), dtype=jnp.float32)
    left = jnp.linspace(-(ks / 2) + 1, -1.0, int(ks / 2), dtype=jnp.float32)
    right = jnp.linspace(0.0, ks / 2 - 1, int(ks / 2), dtype=jnp.float32)
    time_step_Mm = jnp.concatenate([left, right], axis=0)

    if wave_choose == "LM":
        n2 = int(out_channels / 2)
        scale_1 = jnp.linspace(0.1, 2.0, out_channels - n2, dtype=jnp.float32)
        scale_2 = jnp.linspace(0.1, 3.0, n2, dtype=jnp.float32)
        wf1, wf2, t1, t2 = laplace, mexh, time_step_L, time_step_Mm
    elif wave_choose == "Lm":
        n2 = int(out_channels / 2)
        scale_1 = jnp.linspace(0.1, 2.0, out_channels - n2, dtype=jnp.float32)
        scale_2 = jnp.linspace(0.1, 4.5, n2, dtype=jnp.float32)
        wf1, wf2, t1, t2 = laplace, morlet, time_step_L, time_step_Mm
    elif wave_choose == "Mm":
        n2 = int(5 * out_channels / 10.0)
        scale_1 = jnp.linspace(0.1, 3.0, out_channels - n2, dtype=jnp.float32)
        scale_2 = jnp.linspace(0.1, 4.5, n2, dtype=jnp.float32)
        wf1, wf2, t1, t2 = mexh, morlet, time_step_Mm, time_step_Mm
    else:
        raise ValueError("only 2 wavelets are used in dfw_unit_2")

    p1 = t1[None, :] / scale_1[:, None]
    p2 = t2[None, :] / scale_2[:, None]
    filters = jnp.concatenate([wf1(p1), wf2(p2)], axis=0)  # (out_channels, ks)

    # NOTE: in the torch module `layeri_softmaxP` is a zero buffer (filled
    # externally during training).  Zeros would make the fused path trivially
    # zero, so it is initialized deterministically as a row-softmax here.
    logits = jax.random.normal(key, (real_cout, out_channels), dtype=jnp.float32)
    softmaxP = jax.nn.softmax(logits, axis=1)
    return filters, softmaxP, ks


def _round_up(x, m):
    return ((x + m - 1) // m) * m


# ---------------------------------------------------------------------------
# Pallas kernel: K-tap 1-D conv (stride=1, padding=1, dilation=1, groups=1,
# no bias) over a (batch_tile, time_tile) block.  The weight mix
# (softmaxP @ filters) is hoisted to the wrapper; the kernel only does the
# memory-bound conv as scalar*tile FMAs on the VPU (no MXU).
# ---------------------------------------------------------------------------
def _dfw_conv_kernel(w_ref, x_ref, h_ref, o_ref, *, K, C_out):
    """w_ref: (C_out, K)      fused weights in SMEM (scalar reads).
    x_ref: (TB, TT)           current time tile; batch=sublanes, time=lanes.
    h_ref: (TB, H)            halo: first lanes of the *next* time tile.
    o_ref: (C_out, TB, TT)    channel-major output block, lane-dense stores.
    """
    tt = x_ref.shape[1]
    xc = x_ref[...]
    if K > 1:
        # Wrapper already zero-padded the signal, so this is the only
        # stitching needed and it is identical for every tap / every tile.
        slab = jnp.concatenate([xc, h_ref[:, : K - 1]], axis=1)  # (TB, TT+K-1)
    else:
        slab = xc

    # Build the K shifted windows ONCE per grid step and share them across
    # all channels (amortizes the unaligned lane shifts over C_out).
    windows = [slab[:, k:k + tt] for k in range(K)]

    for c in range(C_out):
        acc = w_ref[c, 0] * windows[0]
        for k in range(1, K):
            acc = acc + w_ref[c, k] * windows[k]
        o_ref[c] = acc.astype(o_ref.dtype)


def dfw_unit_2_forward(waveforms, filters, softmaxP, fused_use, *,
                       batch_tile=128, time_tile=512,
                       out_dtype=jnp.float32, channel_major_out=False):
    N, c_in, L = waveforms.shape
    assert c_in == 1, "dfw_unit_2 only supports one input channel"
    out_channels, K = filters.shape

    # Hoisted weight mix: one tiny matmul in the wrapper (or nothing at all
    # when fused_use=False) instead of an MXU push per grid step.
    w = (softmaxP @ filters) if fused_use else filters
    w = w.astype(jnp.float32)
    C_out = w.shape[0]
    T_out = L + 2 - K + 1                      # padding=1 both sides, stride=1

    # ---- lane-dense time tiling (TT multiple of 128) ----------------------
    tt = _round_up(min(time_tile, _round_up(T_out, 128)), 128)
    nt = pl.cdiv(T_out, tt)
    T_pad = nt * tt
    H = _round_up(max(K - 1, 1), 128)          # halo block width (>= K-1)
    assert H <= tt, "kernel taps wider than a time tile are not supported"

    # ---- batch tiling (TB multiple of 8 -> sublane dense) -----------------
    tb = _round_up(min(batch_tile, _round_up(N, 8)), 8)
    nb = pl.cdiv(N, tb)

    # One wrapper-side zero pad of the (small) input covers the conv padding,
    # the inter-tile halo and the T_out->T_pad overrun, so every tap in the
    # kernel is the same uniform slice (no edge-case concats, no OOB time).
    x2d = waveforms.reshape(N, L).astype(jnp.float32)
    L_in = (nt + 1) * tt
    x_pad = jnp.pad(x2d, ((0, 0), (1, L_in - L - 1)))
    # Dense halo array: the first H lanes of tile j+1, so the kernel re-reads
    # only H (=128) lanes per step instead of a whole second tile.
    x_halo = x_pad.reshape(N, nt + 1, tt)[:, 1:, :H].reshape(N, nt * H)

    kernel = functools.partial(_dfw_conv_kernel, K=K, C_out=C_out)

    # VMEM budget derived from the actual block sizes: double-buffered
    # inputs/outputs plus slack for the K spilled window slabs.  Defaults
    # (tb=128, tt=512) stay well under v7x's 64 MiB; 128 MiB parts can raise
    # batch_tile / time_tile for fewer, longer grid steps.
    blk_bytes = 4 * (tb * tt + tb * H + C_out * tb * tt)
    need = 2 * blk_bytes + 4 * (K + 2) * tb * tt + (4 << 20)
    vmem_limit = int(min(max(need, 32 << 20), 100 << 20))

    out_cnt = pl.pallas_call(
        kernel,
        out_shape=jax.ShapeDtypeStruct((C_out, N, T_pad), out_dtype),
        grid=(nb, nt),
        in_specs=[
            pl.BlockSpec(memory_space=pltpu.MemorySpace.SMEM),   # fused weights
            pl.BlockSpec((tb, tt), lambda i, j: (i, j)),         # signal tile
            pl.BlockSpec((tb, H), lambda i, j: (i, j)),          # halo tile
        ],
        out_specs=pl.BlockSpec((C_out, tb, tt), lambda i, j: (0, i, j)),
        compiler_params=pltpu.CompilerParams(
            dimension_semantics=("parallel", "parallel"),
            vmem_limit_bytes=vmem_limit,
        ),
    )(w, x_pad, x_halo)

    if channel_major_out:
        # Fused consumers can take the kernel-native (C_out, N, T) layout and
        # skip the transpose copy below entirely.
        return out_cnt[:, :, :T_out]

    # NCL' (PyTorch conv1d) layout.  This fused transpose+slice is the one
    # remaining full-size copy; writing NCL' directly from the kernel needs a
    # channel<->batch 8x8 sublane relayout per tile which costs more in
    # strided/masked stores than this single XLA copy.
    # TODO(synk): in-register sublane relayout to emit NCL' directly once a
    # robust Mosaic lowering for the (c,b)->(b,c) sublane transpose is vetted.
    return jnp.transpose(out_cnt, (1, 0, 2))[:, :, :T_out]


# ---------------------------------------------------------------------------
# Reference (plain JAX) for verification.
# ---------------------------------------------------------------------------
def dfw_unit_2_reference(waveforms, filters, softmaxP, fused_use):
    w = (softmaxP @ filters) if fused_use else filters
    return lax.conv_general_dilated(
        waveforms.astype(jnp.float32),
        w[:, None, :].astype(jnp.float32),
        window_strides=(1,),
        padding=[(1, 1)],
        dimension_numbers=("NCH", "OIH", "NCH"),
    )


if __name__ == "__main__":
    key = jax.random.PRNGKey(0)
    # (wave_choose, out_channels, real_cout, kernel_size, N, L, batch_tile, time_tile)
    configs = [
        ("LM", 8, 4, 8, 2, 64, 128, 512),     # module-default small shapes
        ("Lm", 8, 4, 8, 10, 200, 8, 128),     # N > tb, N % tb != 0, nt > 1
    ]

    ok = True
    for (wc, oc, rc, ksz, N, L, btile, ttile) in configs:
        key, k_x, k_p = jax.random.split(key, 3)
        waveforms = jax.random.normal(k_x, (N, 1, L), dtype=jnp.float32)
        filters, softmaxP, ks = build_dfw_unit_2(wc, oc, rc, ksz, k_p)

        for fused_use in (True, False):
            out = dfw_unit_2_forward(waveforms, filters, softmaxP, fused_use,
                                     batch_tile=btile, time_tile=ttile)
            out = jax.block_until_ready(out)
            ref = dfw_unit_2_reference(waveforms, filters, softmaxP, fused_use)
            ok &= bool(jnp.allclose(out, ref, atol=1e-5, rtol=1e-5))
            ok &= out.shape == (N, rc if fused_use else oc, L + 2 - ks + 1)

    if ok:
        print("KERNEL_OK")
    else:
        print("KERNEL_MISMATCH")
</pallas_src>

<mosaic_0001>
module attributes {stable_mosaic.version = 11 : i64} {
  func.func @_dfw_conv_kernel(%arg0: i32, %arg1: i32, %arg2: memref<4x8xf32, #tpu.memory_space<smem>>, %arg3: memref<8x128xf32, #tpu.memory_space<vmem>>, %arg4: memref<8x128xf32, #tpu.memory_space<vmem>>, %arg5: memref<4x8x128xf32, #tpu.memory_space<vmem>>) attributes {dimension_semantics = [#tpu.dimension_semantics<parallel>, #tpu.dimension_semantics<parallel>], iteration_bounds = array<i64: 1, 1>, scalar_prefetch = 0 : i64, scratch_operands = 0 : i64, tpu.core_type = #tpu.core_type<tc>, window_params = [{transform_indices = @transform_0, window_bounds = array<i64: 4, 8>}, {transform_indices = @transform_1, window_bounds = array<i64: 8, 128>}, {transform_indices = @transform_2, window_bounds = array<i64: 8, 128>}, {transform_indices = @transform_3, window_bounds = array<i64: 4, 8, 128>}]} {
    %c0 = arith.constant 0 : index
    %c0_0 = arith.constant 0 : index
    %0 = vector.load %arg3[%c0, %c0_0] : memref<8x128xf32, #tpu.memory_space<vmem>>, vector<8x128xf32>
    %c0_1 = arith.constant 0 : index
    %c0_2 = arith.constant 0 : index
    %1 = vector.load %arg4[%c0_1, %c0_2] : memref<8x128xf32, #tpu.memory_space<vmem>>, vector<8x7xf32>
    %2 = tpu.concatenate %0, %1 in 1 : vector<8x128xf32>, vector<8x7xf32> -> vector<8x135xf32>
    %3 = vector.extract_strided_slice %2 {offsets = [0, 0], sizes = [8, 128], strides = [1, 1]} : vector<8x135xf32> to vector<8x128xf32>
    %4 = vector.extract_strided_slice %2 {offsets = [0, 1], sizes = [8, 128], strides = [1, 1]} : vector<8x135xf32> to vector<8x128xf32>
    %5 = vector.extract_strided_slice %2 {offsets = [0, 2], sizes = [8, 128], strides = [1, 1]} : vector<8x135xf32> to vector<8x128xf32>
    %6 = vector.extract_strided_slice %2 {offsets = [0, 3], sizes = [8, 128], strides = [1, 1]} : vector<8x135xf32> to vector<8x128xf32>
    %7 = vector.extract_strided_slice %2 {offsets = [0, 4], sizes = [8, 128], strides = [1, 1]} : vector<8x135xf32> to vector<8x128xf32>
    %8 = vector.extract_strided_slice %2 {offsets = [0, 5], sizes = [8, 128], strides = [1, 1]} : vector<8x135xf32> to vector<8x128xf32>
    %9 = vector.extract_strided_slice %2 {offsets = [0, 6], sizes = [8, 128], strides = [1, 1]} : vector<8x135xf32> to vector<8x128xf32>
    %10 = vector.extract_strided_slice %2 {offsets = [0, 7], sizes = [8, 128], strides = [1, 1]} : vector<8x135xf32> to vector<8x128xf32>
    %c0_3 = arith.constant 0 : index
    %c0_4 = arith.constant 0 : index
    %11 = memref.load %arg2[%c0_3, %c0_4] : memref<4x8xf32, #tpu.memory_space<smem>>
    %12 = vector.broadcast %11 : f32 to vector<8x128xf32>
    %13 = arith.mulf %12, %3 : vector<8x128xf32>
    %c0_5 = arith.constant 0 : index
    %c1 = arith.constant 1 : index
    %14 = memref.load %arg2[%c0_5, %c1] : memref<4x8xf32, #tpu.memory_space<smem>>
    %15 = vector.broadcast %14 : f32 to vector<8x128xf32>
    %16 = arith.mulf %15, %4 : vector<8x128xf32>
    %17 = arith.addf %13, %16 : vector<8x128xf32>
    %c0_6 = arith.constant 0 : index
    %c2 = arith.constant 2 : index
    %18 = memref.load %arg2[%c0_6, %c2] : memref<4x8xf32, #tpu.memory_space<smem>>
    %19 = vector.broadcast %18 : f32 to vector<8x128xf32>
    %20 = arith.mulf %19, %5 : vector<8x128xf32>
    %21 = arith.addf %17, %20 : vector<8x128xf32>
    %c0_7 = arith.constant 0 : index
    %c3 = arith.constant 3 : index
    %22 = memref.load %arg2[%c0_7, %c3] : memref<4x8xf32, #tpu.memory_space<smem>>
    %23 = vector.broadcast %22 : f32 to vector<8x128xf32>
    %24 = arith.mulf %23, %6 : vector<8x128xf32>
    %25 = arith.addf %21, %24 : vector<8x128xf32>
    %c0_8 = arith.constant 0 : index
    %c4 = arith.constant 4 : index
    %26 = memref.load %arg2[%c0_8, %c4] : memref<4x8xf32, #tpu.memory_space<smem>>
    %27 = vector.broadcast %26 : f32 to vector<8x128xf32>
    %28 = arith.mulf %27, %7 : vector<8x128xf32>
    %29 = arith.addf %25, %28 : vector<8x128xf32>
    %c0_9 = arith.constant 0 : index
    %c5 = arith.constant 5 : index
    %30 = memref.load %arg2[%c0_9, %c5] : memref<4x8xf32, #tpu.memory_space<smem>>
    %31 = vector.broadcast %30 : f32 to vector<8x128xf32>
    %32 = arith.mulf %31, %8 : vector<8x128xf32>
    %33 = arith.addf %29, %32 : vector<8x128xf32>
    %c0_10 = arith.constant 0 : index
    %c6 = arith.constant 6 : index
    %34 = memref.load %arg2[%c0_10, %c6] : memref<4x8xf32, #tpu.memory_space<smem>>
    %35 = vector.broadcast %34 : f32 to vector<8x128xf32>
    %36 = arith.mulf %35, %9 : vector<8x128xf32>
    %37 = arith.addf %33, %36 : vector<8x128xf32>
    %c0_11 = arith.constant 0 : index
    %c7 = arith.constant 7 : index
    %38 = memref.load %arg2[%c0_11, %c7] : memref<4x8xf32, #tpu.memory_space<smem>>
    %39 = vector.broadcast %38 : f32 to vector<8x128xf32>
    %40 = arith.mulf %39, %10 : vector<8x128xf32>
    %41 = arith.addf %37, %40 : vector<8x128xf32>
    %c0_12 = arith.constant 0 : index
    %c0_13 = arith.constant 0 : index
    %c0_14 = arith.constant 0 : index
    %42 = vector.load %arg5[%c0_12, %c0_13, %c0_14] : memref<4x8x128xf32, #tpu.memory_space<vmem>>, vector<1x8x128xf32>
    %43 = vector.shape_cast %42 : vector<1x8x128xf32> to vector<8x128xf32>
    %44 = vector.shape_cast %41 : vector<8x128xf32> to vector<1x8x128xf32>
    tpu.vector_store %arg5[%c0_12, %c0_13, %c0_14], %44 {strides = array<i32>} : memref<4x8x128xf32, #tpu.memory_space<vmem>>, vector<1x8x128xf32>,
    %c1_15 = arith.constant 1 : index
    %c0_16 = arith.constant 0 : index
    %45 = memref.load %arg2[%c1_15, %c0_16] : memref<4x8xf32, #tpu.memory_space<smem>>
    %46 = vector.broadcast %45 : f32 to vector<8x128xf32>
    %47 = arith.mulf %46, %3 : vector<8x128xf32>
    %c1_17 = arith.constant 1 : index
    %c1_18 = arith.constant 1 : index
    %48 = memref.load %arg2[%c1_17, %c1_18] : memref<4x8xf32, #tpu.memory_space<smem>>
    %49 = vector.broadcast %48 : f32 to vector<8x128xf32>
    %50 = arith.mulf %49, %4 : vector<8x128xf32>
    %51 = arith.addf %47, %50 : vector<8x128xf32>
    %c1_19 = arith.constant 1 : index
    %c2_20 = arith.constant 2 : index
    %52 = memref.load %arg2[%c1_19, %c2_20] : memref<4x8xf32, #tpu.memory_space<smem>>
    %53 = vector.broadcast %52 : f32 to vector<8x128xf32>
    %54 = arith.mulf %53, %5 : vector<8x128xf32>
    %55 = arith.addf %51, %54 : vector<8x128xf32>
    %c1_21 = arith.constant 1 : index
    %c3_22 = arith.constant 3 : index
    %56 = memref.load %arg2[%c1_21, %c3_22] : memref<4x8xf32, #tpu.memory_space<smem>>
    %57 = vector.broadcast %56 : f32 to vector<8x128xf32>
    %58 = arith.mulf %57, %6 : vector<8x128xf32>
    %59 = arith.addf %55, %58 : vector<8x128xf32>
    %c1_23 = arith.constant 1 : index
    %c4_24 = arith.constant 4 : index
    %60 = memref.load %arg2[%c1_23, %c4_24] : memref<4x8xf32, #tpu.memory_space<smem>>
    %61 = vector.broadcast %60 : f32 to vector<8x128xf32>
    %62 = arith.mulf %61, %7 : vector<8x128xf32>
    %63 = arith.addf %59, %62 : vector<8x128xf32>
    %c1_25 = arith.constant 1 : index
    %c5_26 = arith.constant 5 : index
    %64 = memref.load %arg2[%c1_25, %c5_26] : memref<4x8xf32, #tpu.memory_space<smem>>
    %65 = vector.broadcast %64 : f32 to vector<8x128xf32>
    %66 = arith.mulf %65, %8 : vector<8x128xf32>
    %67 = arith.addf %63, %66 : vector<8x128xf32>
    %c1_27 = arith.constant 1 : index
    %c6_28 = arith.constant 6 : index
    %68 = memref.load %arg2[%c1_27, %c6_28] : memref<4x8xf32, #tpu.memory_space<smem>>
    %69 = vector.broadcast %68 : f32 to vector<8x128xf32>
    %70 = arith.mulf %69, %9 : vector<8x128xf32>
    %71 = arith.addf %67, %70 : vector<8x128xf32>
    %c1_29 = arith.constant 1 : index
    %c7_30 = arith.constant 7 : index
    %72 = memref.load %arg2[%c1_29, %c7_30] : memref<4x8xf32, #tpu.memory_space<smem>>
    %73 = vector.broadcast %72 : f32 to vector<8x128xf32>
    %74 = arith.mulf %73, %10 : vector<8x128xf32>
    %75 = arith.addf %71, %74 : vector<8x128xf32>
    %c1_31 = arith.constant 1 : index
    %c0_32 = arith.constant 0 : index
    %c0_33 = arith.constant 0 : index
    %76 = vector.load %arg5[%c1_31, %c0_32, %c0_33] : memref<4x8x128xf32, #tpu.memory_space<vmem>>, vector<1x8x128xf32>
    %77 = vector.shape_cast %76 : vector<1x8x128xf32> to vector<8x128xf32>
    %78 = vector.shape_cast %75 : vector<8x128xf32> to vector<1x8x128xf32>
    tpu.vector_store %arg5[%c1_31, %c0_32, %c0_33], %78 {strides = array<i32>} : memref<4x8x128xf32, #tpu.memory_space<vmem>>, vector<1x8x128xf32>,
    %c2_34 = arith.constant 2 : index
    %c0_35 = arith.constant 0 : index
    %79 = memref.load %arg2[%c2_34, %c0_35] : memref<4x8xf32, #tpu.memory_space<smem>>
    %80 = vector.broadcast %79 : f32 to vector<8x128xf32>
    %81 = arith.mulf %80, %3 : vector<8x128xf32>
    %c2_36 = arith.constant 2 : index
    %c1_37 = arith.constant 1 : index
    %82 = memref.load %arg2[%c2_36, %c1_37] : memref<4x8xf32, #tpu.memory_space<smem>>
    %83 = vector.broadcast %82 : f32 to vector<8x128xf32>
    %84 = arith.mulf %83, %4 : vector<8x128xf32>
    %85 = arith.addf %81, %84 : vector<8x128xf32>
    %c2_38 = arith.constant 2 : index
    %c2_39 = arith.constant 2 : index
    %86 = memref.load %arg2[%c2_38, %c2_39] : memref<4x8xf32, #tpu.memory_space<smem>>
    %87 = vector.broadcast %86 : f32 to vector<8x128xf32>
    %88 = arith.mulf %87, %5 : vector<8x128xf32>
    %89 = arith.addf %85, %88 : vector<8x128xf32>
    %c2_40 = arith.constant 2 : index
    %c3_41 = arith.constant 3 : index
    %90 = memref.load %arg2[%c2_40, %c3_41] : memref<4x8xf32, #tpu.memory_space<smem>>
    %91 = vector.broadcast %90 : f32 to vector<8x128xf32>
    %92 = arith.mulf %91, %6 : vector<8x128xf32>
    %93 = arith.addf %89, %92 : vector<8x128xf32>
    %c2_42 = arith.constant 2 : index
    %c4_43 = arith.constant 4 : index
    %94 = memref.load %arg2[%c2_42, %c4_43] : memref<4x8xf32, #tpu.memory_space<smem>>
    %95 = vector.broadcast %94 : f32 to vector<8x128xf32>
    %96 = arith.mulf %95, %7 : vector<8x128xf32>
    %97 = arith.addf %93, %96 : vector<8x128xf32>
    %c2_44 = arith.constant 2 : index
    %c5_45 = arith.constant 5 : index
    %98 = memref.load %arg2[%c2_44, %c5_45] : memref<4x8xf32, #tpu.memory_space<smem>>
    %99 = vector.broadcast %98 : f32 to vector<8x128xf32>
    %100 = arith.mulf %99, %8 : vector<8x128xf32>
    %101 = arith.addf %97, %100 : vector<8x128xf32>
    %c2_46 = arith.constant 2 : index
    %c6_47 = arith.constant 6 : index
    %102 = memref.load %arg2[%c2_46, %c6_47] : memref<4x8xf32, #tpu.memory_space<smem>>
    %103 = vector.broadcast %102 : f32 to vector<8x128xf32>
    %104 = arith.mulf %103, %9 : vector<8x128xf32>
    %105 = arith.addf %101, %104 : vector<8x128xf32>
    %c2_48 = arith.constant 2 : index
    %c7_49 = arith.constant 7 : index
    %106 = memref.load %arg2[%c2_48, %c7_49] : memref<4x8xf32, #tpu.memory_space<smem>>
    %107 = vector.broadcast %106 : f32 to vector<8x128xf32>
    %108 = arith.mulf %107, %10 : vector<8x128xf32>
    %109 = arith.addf %105, %108 : vector<8x128xf32>
    %c2_50 = arith.constant 2 : index
    %c0_51 = arith.constant 0 : index
    %c0_52 = arith.constant 0 : index
    %110 = vector.load %arg5[%c2_50, %c0_51, %c0_52] : memref<4x8x128xf32, #tpu.memory_space<vmem>>, vector<1x8x128xf32>
    %111 = vector.shape_cast %110 : vector<1x8x128xf32> to vector<8x128xf32>
    %112 = vector.shape_cast %109 : vector<8x128xf32> to vector<1x8x128xf32>
    tpu.vector_store %arg5[%c2_50, %c0_51, %c0_52], %112 {strides = array<i32>} : memref<4x8x128xf32, #tpu.memory_space<vmem>>, vector<1x8x128xf32>,
    %c3_53 = arith.constant 3 : index
    %c0_54 = arith.constant 0 : index
    %113 = memref.load %arg2[%c3_53, %c0_54] : memref<4x8xf32, #tpu.memory_space<smem>>
    %114 = vector.broadcast %113 : f32 to vector<8x128xf32>
    %115 = arith.mulf %114, %3 : vector<8x128xf32>
    %c3_55 = arith.constant 3 : index
    %c1_56 = arith.constant 1 : index
    %116 = memref.load %arg2[%c3_55, %c1_56] : memref<4x8xf32, #tpu.memory_space<smem>>
    %117 = vector.broadcast %116 : f32 to vector<8x128xf32>
    %118 = arith.mulf %117, %4 : vector<8x128xf32>
    %119 = arith.addf %115, %118 : vector<8x128xf32>
    %c3_57 = arith.constant 3 : index
    %c2_58 = arith.constant 2 : index
    %120 = memref.load %arg2[%c3_57, %c2_58] : memref<4x8xf32, #tpu.memory_space<smem>>
    %121 = vector.broadcast %120 : f32 to vector<8x128xf32>
    %122 = arith.mulf %121, %5 : vector<8x128xf32>
    %123 = arith.addf %119, %122 : vector<8x128xf32>
    %c3_59 = arith.constant 3 : index
    %c3_60 = arith.constant 3 : index
    %124 = memref.load %arg2[%c3_59, %c3_60] : memref<4x8xf32, #tpu.memory_space<smem>>
    %125 = vector.broadcast %124 : f32 to vector<8x128xf32>
    %126 = arith.mulf %125, %6 : vector<8x128xf32>
    %127 = arith.addf %123, %126 : vector<8x128xf32>
    %c3_61 = arith.constant 3 : index
    %c4_62 = arith.constant 4 : index
    %128 = memref.load %arg2[%c3_61, %c4_62] : memref<4x8xf32, #tpu.memory_space<smem>>
    %129 = vector.broadcast %128 : f32 to vector<8x128xf32>
    %130 = arith.mulf %129, %7 : vector<8x128xf32>
    %131 = arith.addf %127, %130 : vector<8x128xf32>
    %c3_63 = arith.constant 3 : index
    %c5_64 = arith.constant 5 : index
    %132 = memref.load %arg2[%c3_63, %c5_64] : memref<4x8xf32, #tpu.memory_space<smem>>
    %133 = vector.broadcast %132 : f32 to vector<8x128xf32>
    %134 = arith.mulf %133, %8 : vector<8x128xf32>
    %135 = arith.addf %131, %134 : vector<8x128xf32>
    %c3_65 = arith.constant 3 : index
    %c6_66 = arith.constant 6 : index
    %136 = memref.load %arg2[%c3_65, %c6_66] : memref<4x8xf32, #tpu.memory_space<smem>>
    %137 = vector.broadcast %136 : f32 to vector<8x128xf32>
    %138 = arith.mulf %137, %9 : vector<8x128xf32>
    %139 = arith.addf %135, %138 : vector<8x128xf32>
    %c3_67 = arith.constant 3 : index
    %c7_68 = arith.constant 7 : index
    %140 = memref.load %arg2[%c3_67, %c7_68] : memref<4x8xf32, #tpu.memory_space<smem>>
    %141 = vector.broadcast %140 : f32 to vector<8x128xf32>
    %142 = arith.mulf %141, %10 : vector<8x128xf32>
    %143 = arith.addf %139, %142 : vector<8x128xf32>
    %c3_69 = arith.constant 3 : index
    %c0_70 = arith.constant 0 : index
    %c0_71 = arith.constant 0 : index
    %144 = vector.load %arg5[%c3_69, %c0_70, %c0_71] : memref<4x8x128xf32, #tpu.memory_space<vmem>>, vector<1x8x128xf32>
    %145 = vector.shape_cast %144 : vector<1x8x128xf32> to vector<8x128xf32>
    %146 = vector.shape_cast %143 : vector<8x128xf32> to vector<1x8x128xf32>
    tpu.vector_store %arg5[%c3_69, %c0_70, %c0_71], %146 {strides = array<i32>} : memref<4x8x128xf32, #tpu.memory_space<vmem>>, vector<1x8x128xf32>,
    return
  }
  func.func @transform_0(%arg0: i32, %arg1: i32) -> (i32, i32) {
    %c0_i32 = arith.constant 0 : i32
    %c0_i32_0 = arith.constant 0 : i32
    %c0_i32_1 = arith.constant 0 : i32
    return %c0_i32, %c0_i32_0 : i32, i32
  }
  func.func @transform_1(%arg0: i32, %arg1: i32) -> (i32, i32) {
    %c0_i32 = arith.constant 0 : i32
    return %arg0, %arg1 : i32, i32
  }
  func.func @transform_2(%arg0: i32, %arg1: i32) -> (i32, i32) {
    %c0_i32 = arith.constant 0 : i32
    return %arg0, %arg1 : i32, i32
  }
  func.func @transform_3(%arg0: i32, %arg1: i32) -> (i32, i32, i32) {
    %c0_i32 = arith.constant 0 : i32
    %c0_i32_0 = arith.constant 0 : i32
    return %c0_i32, %arg0, %arg1 : i32, i32, i32
  }
}

</mosaic_0001>

<bundles_post_ra>
// kernel: tpu_custom_call.1
= control target key start
LH: loop header
LB: loop body
LE: loop exit
PB: predicated region body
PF: predicated region fallthrough
CT: control target
= control target key end

     0   :  { %8 = vsyncpa [#allocation5], 0  ;;  %s823_s0 = inlined_call_operand.hbm [shape: f32[4,8], index: 0, kind: input, shape index: {}]   ;;  %s824_s1 = inlined_call_operand.hbm [shape: f32[2,256], index: 1, kind: input, shape index: {}]   ;;  %s825_s2 = inlined_call_operand.hbm [shape: f32[2,128], index: 2, kind: input, shape index: {}]   ;;  %s826_s3 = inlined_call_operand.hbm [shape: f32[4,2,128], index: 3, kind: output, shape index: {}]  }
   0x1   :  { %9 = vsyncpa [#allocation3], 0 }
   0x2   :  { %10 = vsyncpa [#allocation8], 0 }
   0x3   :  { %11 = vsyncpa [#allocation4], 0  ;;  %s17_s14 = sshll.u32 %s823_s0, 4  ;;  %s616_s15 = smov [#allocation2]   ;;  %s18_s14 = int_to_ptr.hbm [resolvable:$true] %s17_s14 }
   0x4   :  { %20 = dma.hbm_to_smem %s18_s14, 64, %s616_s15, [#allocation5]  }
   0x5   :  { %24 = vsyncadd [#allocation3], 96  ;;  %s25_s18 = sshll.u32 %s824_s1, 4  ;;  %s617_s19 = smov [#allocation6]   ;;  %s26_s18 = int_to_ptr.hbm [resolvable:$true] %s25_s18 }
   0x6   :  { %s27_s20 = sshll.u32 %s617_s19, 4  ;;  %s618_s21 = smov 64   ;;  %s28_s20 = int_to_ptr.vmem [resolvable:$true] %s27_s20 }
   0x7   :  { %s619_s22 = smov 32   ;;  %s620_s23 = smov 2  }
   0x8   :  { %33 = dma.hbm_to_vmem [thread:$0]  %s26_s18, 32, %s28_s20, [#allocation3], %s618_s21, %s619_s22, %s620_s23  }
   0x9   :  { %37 = vsyncadd [#allocation8], 96  ;;  %s38_s0 = sshll.u32 %s825_s2, 4  ;;  %s621_s26 = smov [#allocation7]   ;;  %s39_s0 = int_to_ptr.hbm [resolvable:$true] %s38_s0 }
   0xa   :  { %s40_s27 = sshll.u32 %s621_s26, 4  ;;  %s41_s27 = int_to_ptr.vmem [resolvable:$true] %s40_s27 }
   0xb   :  { %46 = dma.hbm_to_vmem [thread:$0]  %s39_s0, 32, %s41_s27, [#allocation8], %s619_s22, %s619_s22, %s620_s23  }
   0xc   :  { %608 = dma.done.wait [#allocation5], 64  }
   0xd   :  { %609 = vsyncadd [#allocation5], 4294967232 }
   0xe   :  { %610 = dma.done.wait [#allocation3], 128  }
   0xf   :  { %611 = vsyncadd [#allocation3], 4294967168 }
  0x10   :  { %612 = dma.done.wait [#allocation8], 128  }
  0x11   :  { %613 = vsyncadd [#allocation8], 4294967168 }
  0x12   :  { %59 = sfence }
  0x13   :  { %s497_s1 = sld [smem:[#allocation2 + $0x2]]  ;;  %v666_v0 = vld [vmem:[#allocation6] sm:$0xff]  ;;  %s622_s2 = smov 126   ;;  %v671_v6 = vld [vmem:[#allocation7] sm:$0xff]  ;;  %vm75_vm0 = vcmask 1039360   ;;  %vm89_vm1 = vcmask 1031168  }
  0x14   :  { %s496_s28 = sld [smem:[#allocation2 + $0x1]]  ;;  %s623_s30 = smov 127   ;;  %vm103_vm2 = vcmask 1022976   ;;  %vm117_vm3 = vcmask 1014784   ;;  %vm131_vm4 = vcmask 1006592   ;;  %vm145_vm5 = vcmask 998400  }
  0x15   :  { %s498_s29 = sld [smem:[#allocation2 + $0x3]]  ;;  %s624_s5 = smov 125   ;;  %vm159_vm6 = vcmask 990208  }
  0x16   :  { %s499_s4 = sld [smem:[#allocation2 + $0x4]]  ;;  %s625_s8 = smov 124  }
  0x17   :  { %s500_s6 = sld [smem:[#allocation2 + $0x5]]  ;;  %s626_s10 = smov 123  }
  0x18   :  { %s501_s7 = sld [smem:[#allocation2 + $0x6]]  ;;  %s627_s12 = smov 122  }
  0x19   :  { %v80_v1 = vstv %s497_s1  ;;  %s502_s9 = sld [smem:[#allocation2 + $0x7]]  ;;  %s628_s14 = smov 121  }
  0x1a   :  { %v81_v2 = vmul.f32 %v80_v1, %v666_v0  ;;  %v66_v3 = vstv %s496_s28  ;;  %v82_v8 = vmul.f32 %v80_v1, %v671_v6  ;;  %s504_s11 = sld [smem:[#allocation2 + $0x81]] }
  0x1b   :  { %v67_v4 = vmul.f32 %v66_v3, %v666_v0  ;;  %v94_v5 = vstv %s498_s29  ;;  %v68_v9 = vmul.f32 %v66_v3, %v671_v6  ;;  %s505_s13 = sld [smem:[#allocation2 + $0x82]] }
  0x1c   :  { %85 = vrot.lane.b32.xlu1 %v81_v2, %s622_s2  ;;  %v95_v7 = vmul.f32 %v94_v5, %v666_v0  ;;  %v96_v10 = vmul.f32 %v94_v5, %v671_v6  ;;  %v108_v11 = vstv %s499_s4  ;;  %s506_s15 = sld [smem:[#allocation2 + $0x83]] }
  0x1d   :  { %71 = vrot.lane.b32.xlu0 %v67_v4, %s623_s30  ;;  %v110_v12 = vmul.f32 %v108_v11, %v671_v6  ;;  %v109_v13 = vmul.f32 %v108_v11, %v666_v0  ;;  %v122_v14 = vstv %s500_s6  ;;  %s507_s16 = sld [smem:[#allocation2 + $0x84]] }
  0x1e   :  { %99 = vrot.lane.b32.xlu2 %v95_v7, %s624_s5  ;;  %v123_v15 = vmul.f32 %v122_v14, %v666_v0  ;;  %v136_v16 = vstv %s501_s7  ;;  %v124_v18 = vmul.f32 %v122_v14, %v671_v6  ;;  %s508_s17 = sld [smem:[#allocation2 + $0x85]] }
  0x1f   :  { %v137_v17 = vmul.f32 %v136_v16, %v666_v0  ;;  %v138_v19 = vmul.f32 %v136_v16, %v671_v6  ;;  %v150_v20 = vstv %s502_s9  ;;  %s509_s18 = sld [smem:[#allocation2 + $0x86]] }
  0x20   :  { %v152_v21 = vmul.f32 %v150_v20, %v671_v6  ;;  %v151_v22 = vmul.f32 %v150_v20, %v666_v0  ;;  %v168_v23 = vstv %s504_s11  ;;  %s510_s19 = sld [smem:[#allocation2 + $0x87]] }
  0x21   :  { %v169_v24 = vmul.f32 %v168_v23, %v666_v0  ;;  %v181_v25 = vstv %s505_s13  ;;  %v170_v27 = vmul.f32 %v168_v23, %v671_v6  ;;  %s512_s20 = sld [smem:[#allocation2 + $0x101]] }
  0x22   :  { %v182_v26 = vmul.f32 %v181_v25, %v666_v0  ;;  %v183_v28 = vmul.f32 %v181_v25, %v671_v6  ;;  %v194_v29 = vstv %s506_s15  ;;  %s513_s21 = sld [smem:[#allocation2 + $0x102]] }
  0x23   :  { %v196_v30 = vmul.f32 %v194_v29, %v671_v6  ;;  %v195_v31 = vmul.f32 %v194_v29, %v666_v0  ;;  %v207_v32 = vstv %s507_s16  ;;  %s514_s22 = sld [smem:[#allocation2 + $0x103]] }
  0x24   :  { %87 = vrot.lane.b32.xlu1 %v82_v8, %s622_s2  ;;  %v208_v33 = vmul.f32 %v207_v32, %v666_v0  ;;  %v220_v34 = vstv %s508_s17  ;;  %v209_v36 = vmul.f32 %v207_v32, %v671_v6  ;;  %s515_s23 = sld [smem:[#allocation2 + $0x104]] }
  0x25   :  { %73 = vrot.lane.b32.xlu0 %v68_v9, %s623_s30  ;;  %v221_v35 = vmul.f32 %v220_v34, %v666_v0  ;;  %v222_v37 = vmul.f32 %v220_v34, %v671_v6  ;;  %v233_v38 = vstv %s509_s18  ;;  %s516_s24 = sld [smem:[#allocation2 + $0x105]] }
  0x26   :  { %101 = vrot.lane.b32.xlu2 %v96_v10, %s624_s5  ;;  %v235_v39 = vmul.f32 %v233_v38, %v671_v6  ;;  %v234_v40 = vmul.f32 %v233_v38, %v666_v0  ;;  %v246_v41 = vstv %s510_s19  ;;  %s520_s25 = sld [smem:[#allocation2 + $0x181]] }
  0x27   :  { %v247_v42 = vmul.f32 %v246_v41, %v666_v0  ;;  %v264_v43 = vstv %s512_s20  ;;  %v248_v45 = vmul.f32 %v246_v41, %v671_v6  ;;  %s521_s0 = sld [smem:[#allocation2 + $0x182]] }
  0x28   :  { %v265_v44 = vmul.f32 %v264_v43, %v666_v0  ;;  %v266_v46 = vmul.f32 %v264_v43, %v671_v6  ;;  %v277_v47 = vstv %s513_s21  ;;  %s522_s26 = sld [smem:[#allocation2 + $0x183]] }
  0x29   :  { %v279_v48 = vmul.f32 %v277_v47, %v671_v6  ;;  %v278_v49 = vmul.f32 %v277_v47, %v666_v0  ;;  %v290_v50 = vstv %s514_s22  ;;  %s523_s27 = sld [smem:[#allocation2 + $0x184]] }
  0x2a   :  { %v291_v51 = vmul.f32 %v290_v50, %v666_v0  ;;  %v303_v52 = vstv %s515_s23  ;;  %v292_v54 = vmul.f32 %v290_v50, %v671_v6  ;;  %s524_s1 = sld [smem:[#allocation2 + $0x185]] }
  0x2b   :  { %v304_v53 = vmul.f32 %v303_v52, %v666_v0  ;;  %v305_v55 = vmul.f32 %v303_v52, %v671_v6  ;;  %v316_v56 = vstv %s516_s24  ;;  %s517_s28 = sld [smem:[#allocation2 + $0x106]] }
  0x2c   :  { %115 = vrot.lane.b32.xlu1 %v110_v12, %s625_s8  ;;  %v318_v57 = vmul.f32 %v316_v56, %v671_v6  ;;  %v317_v58 = vmul.f32 %v316_v56, %v666_v0  ;;  %v360_v60 = vstv %s520_s25  ;;  %s62_s29 = sld [smem:[#allocation2]] }
  0x2d   :  { %113 = vrot.lane.b32.xlu0 %v109_v13, %s625_s8  ;;  %v361_v61 = vmul.f32 %v360_v60, %v666_v0  ;;  %v373_v62 = vstv %s521_s0  ;;  %v362_v1 = vmul.f32 %v360_v60, %v671_v6  ;;  %s526_s4 = sld [smem:[#allocation2 + $0x187]] }
  0x2e   :  { %127 = vrot.lane.b32.xlu2 %v123_v15, %s626_s10  ;;  %v374_v63 = vmul.f32 %v373_v62, %v666_v0  ;;  %v375_v3 = vmul.f32 %v373_v62, %v671_v6  ;;  %v386_v4 = vstv %s522_s26  ;;  %s511_s6 = sld [smem:[#allocation2 + $0x100]] }
  0x2f   :  { %v388_v5 = vmul.f32 %v386_v4, %v671_v6  ;;  %v387_v7 = vmul.f32 %v386_v4, %v666_v0  ;;  %v399_v9 = vstv %s523_s27  ;;  %s519_s7 = sld [smem:[#allocation2 + $0x180]] }
  0x30   :  { %v400_v10 = vmul.f32 %v399_v9, %v666_v0  ;;  %v412_v11 = vstv %s524_s1  ;;  %v401_v15 = vmul.f32 %v399_v9, %v671_v6 }
  0x31   :  { %v413_v14 = vmul.f32 %v412_v11, %v666_v0 }
  0x34   :  { %141 = vrot.lane.b32.xlu1 %v137_v17, %s627_s12  ;;  %v414_v17 = vmul.f32 %v412_v11, %v671_v6 }
  0x35   :  { %129 = vrot.lane.b32.xlu0 %v124_v18, %s626_s10  ;;  %v329_v18 = vstv %s517_s28 }
  0x36   :  { %143 = vrot.lane.b32.xlu2 %v138_v19, %s627_s12  ;;  %v330_v23 = vmul.f32 %v329_v18, %v666_v0 }
  0x3c   :  { %157 = vrot.lane.b32.xlu1 %v152_v21, %s628_s14  ;;  %v63_v21 = vstv %s62_s29 }
  0x3d   :  { %155 = vrot.lane.b32.xlu0 %v151_v22, %s628_s14  ;;  %v331_v22 = vmul.f32 %v329_v18, %v671_v6 }
  0x3e   :  { %173 = vrot.lane.b32.xlu2 %v169_v24, %s623_s30 }
  0x44   :  { %186 = vrot.lane.b32.xlu1 %v182_v26, %s622_s2  ;;  %v64_v26 = vmul.f32 %v63_v21, %v666_v0 }
  0x45   :  { %175 = vrot.lane.b32.xlu0 %v170_v27, %s623_s30 }
  0x46   :  { %188 = vrot.lane.b32.xlu2 %v183_v28, %s622_s2 }
  0x4c   :  { %201 = vrot.lane.b32.xlu1 %v196_v30, %s624_s5 }
  0x4d   :  { %199 = vrot.lane.b32.xlu0 %v195_v31, %s624_s5 }
  0x4e   :  { %212 = vrot.lane.b32.xlu2 %v208_v33, %s625_s8 }
  0x54   :  { %225 = vrot.lane.b32.xlu1 %v221_v35, %s626_s10 }
  0x55   :  { %214 = vrot.lane.b32.xlu0 %v209_v36, %s625_s8 }
  0x56   :  { %227 = vrot.lane.b32.xlu2 %v222_v37, %s626_s10 }
  0x5c   :  { %240 = vrot.lane.b32.xlu1 %v235_v39, %s627_s12  ;;  %v438_v39 = vstv %s526_s4 }
  0x5d   :  { %238 = vrot.lane.b32.xlu0 %v234_v40, %s627_s12 }
  0x5e   :  { %251 = vrot.lane.b32.xlu2 %v247_v42, %s628_s14 }
  0x64   :  { %269 = vrot.lane.b32.xlu1 %v265_v44, %s623_s30 }
  0x65   :  { %253 = vrot.lane.b32.xlu0 %v248_v45, %s628_s14 }
  0x66   :  { %271 = vrot.lane.b32.xlu2 %v266_v46, %s623_s30  ;;  %v440_v46 = vmul.f32 %v438_v39, %v671_v6 }
  0x6c   :  { %284 = vrot.lane.b32.xlu1 %v279_v48, %s622_s2  ;;  %v439_v48 = vmul.f32 %v438_v39, %v666_v0  ;;  %v261_v39 = vstv %s511_s6 }
  0x6d   :  { %282 = vrot.lane.b32.xlu0 %v278_v49, %s622_s2 }
  0x6e   :  { %295 = vrot.lane.b32.xlu2 %v291_v51, %s624_s5 }
  0x74   :  { %308 = vrot.lane.b32.xlu1 %v304_v53, %s625_s8 }
  0x75   :  { %297 = vrot.lane.b32.xlu0 %v292_v54, %s624_s5 }
  0x76   :  { %310 = vrot.lane.b32.xlu2 %v305_v55, %s625_s8 }
  0x78   :  { %v744_v59 = vpop.permute.xlu2 %99 }
  0x7c   :  { %323 = vrot.lane.b32.xlu1 %v318_v57, %s626_s10 }
  0x7d   :  { %321 = vrot.lane.b32.xlu0 %v317_v58, %s626_s10 }
  0x7e   :  { %365 = vrot.lane.b32.xlu2 %v361_v61, %s623_s30 }
  0x80   :  { %v752_v2 = vpop.permute.xlu2 %101 }
  0x81   :  { %v104_v40 = vsel %vm103_vm2, %v744_v59, %v752_v2 }
  0x84   :  { %378 = vrot.lane.b32.xlu1 %v374_v63, %s622_s2 }
  0x85   :  { %367 = vrot.lane.b32.xlu0 %v362_v1, %s623_s30  ;;  %s518_s30 = sld [smem:[#allocation2 + $0x107]] }
  0x86   :  { %380 = vrot.lane.b32.xlu2 %v375_v3, %s622_s2  ;;  %s525_s2 = sld [smem:[#allocation2 + $0x186]] }
  0x88   :  { %v128_v8 = vpop.permute.xlu2 %127 }
  0x8b   :  { %v342_v29 = vstv %s518_s30 }
  0x8c   :  { %393 = vrot.lane.b32.xlu1 %v388_v5, %s624_s5  ;;  %v425_v25 = vstv %s525_s2  ;;  %v343_v33 = vmul.f32 %v342_v29, %v666_v0  ;;  %v344_v38 = vmul.f32 %v342_v29, %v671_v6 }
  0x8d   :  { %391 = vrot.lane.b32.xlu0 %v387_v7, %s624_s5  ;;  %v426_v27 = vmul.f32 %v425_v25, %v666_v0  ;;  %v427_v34 = vmul.f32 %v425_v25, %v671_v6  ;;  %s503_s5 = sld [smem:[#allocation2 + $0x80]] }
  0x8e   :  { %v86_v12 = vpop.permute.xlu1 %85  ;;  %404 = vrot.lane.b32.xlu2 %v400_v10, %s625_s8 }
  0x8f   :  { %v72_v13 = vpop.permute.xlu0 %71 }
  0x90   :  { %v144_v16 = vpop.permute.xlu2 %143 }
  0x93   :  { %v165_v62 = vstv %s503_s5 }
  0x94   :  { %417 = vrot.lane.b32.xlu1 %v413_v14, %s626_s10  ;;  %v166_v1 = vmul.f32 %v165_v62, %v666_v0 }
  0x95   :  { %406 = vrot.lane.b32.xlu0 %v401_v15, %s625_s8 }
  0x96   :  { %v88_v19 = vpop.permute.xlu1 %87  ;;  %419 = vrot.lane.b32.xlu2 %v414_v17, %s626_s10 }
  0x97   :  { %v74_v20 = vpop.permute.xlu0 %73  ;;  %v90_v36 = vsel %vm89_vm1, %v86_v12, %v88_v19 }
  0x98   :  { %v174_v24 = vpop.permute.xlu2 %173  ;;  %v76_v28 = vsel %vm75_vm0, %v72_v13, %v74_v20 }
  0x99   :  { %v78_v31 = vadd.f32 %v76_v28, %v64_v26 }
  0x9b   :  { %v92_v37 = vadd.f32 %v90_v36, %v78_v31 }
  0x9c   :  { %336 = vrot.lane.b32.xlu1 %v331_v22, %s627_s12 }
  0x9d   :  { %334 = vrot.lane.b32.xlu0 %v330_v23, %s627_s12  ;;  %v106_v43 = vadd.f32 %v104_v40, %v92_v37  ;;  %v262_v40 = vmul.f32 %v261_v39, %v666_v0 }
  0x9e   :  { %v116_v30 = vpop.permute.xlu1 %115  ;;  %430 = vrot.lane.b32.xlu2 %v426_v27, %s627_s12 }
  0x9f   :  { %v114_v32 = vpop.permute.xlu0 %113 }
  0xa0   :  { %v189_v35 = vpop.permute.xlu2 %188  ;;  %v118_v41 = vsel %vm117_vm3, %v114_v32, %v116_v30 }
  0xa1   :  { %v120_v47 = vadd.f32 %v118_v41, %v106_v43 }
  0xa4   :  { %347 = vrot.lane.b32.xlu1 %v343_v33, %s628_s14 }
  0xa5   :  { %432 = vrot.lane.b32.xlu0 %v427_v34, %s627_s12 }
  0xa6   :  { %v142_v42 = vpop.permute.xlu1 %141  ;;  %349 = vrot.lane.b32.xlu2 %v344_v38, %s628_s14 }
  0xa7   :  { %v130_v44 = vpop.permute.xlu0 %129  ;;  %v146_v51 = vsel %vm145_vm5, %v142_v42, %v144_v16 }
  0xa8   :  { %v132_v45 = vsel %vm131_vm4, %v128_v8, %v130_v44  ;;  %v213_v49 = vpop.permute.xlu2 %212 }
  0xa9   :  { %v134_v50 = vadd.f32 %v132_v45, %v120_v47 }
  0xab   :  { %v148_v54 = vadd.f32 %v146_v51, %v134_v50 }
  0xac   :  { %445 = vrot.lane.b32.xlu1 %v440_v46, %s628_s14  ;;  %v357_v46 = vstv %s519_s7 }
  0xad   :  { %443 = vrot.lane.b32.xlu0 %v439_v48, %s628_s14  ;;  %v358_v50 = vmul.f32 %v357_v46, %v666_v0 }
  0xae   :  { %v158_v52 = vpop.permute.xlu1 %157 }
  0xaf   :  { %v156_v53 = vpop.permute.xlu0 %155 }
  0xb0   :  { %v160_v55 = vsel %vm159_vm6, %v156_v53, %v158_v52  ;;  %v228_v6 = vpop.permute.xlu2 %227 }
  0xb1   :  { %v162_v56 = vadd.f32 %v160_v55, %v148_v54 }
  0xb3   :  { %163 = vst [vmem:[#allocation9] sm:$0xff] %v162_v56 }
  0xb6   :  { %v187_v57 = vpop.permute.xlu1 %186 }
  0xb7   :  { %v176_v58 = vpop.permute.xlu0 %175  ;;  %v190_v7 = vsel %vm89_vm1, %v187_v57, %v189_v35 }
  0xb8   :  { %v252_v59 = vpop.permute.xlu2 %251  ;;  %v177_v2 = vsel %vm75_vm0, %v174_v24, %v176_v58 }
  0xb9   :  { %v179_v5 = vadd.f32 %v177_v2, %v166_v1 }
  0xbb   :  { %v192_v9 = vadd.f32 %v190_v7, %v179_v5 }
  0xbe   :  { %v202_v60 = vpop.permute.xlu1 %201 }
  0xbf   :  { %v200_v61 = vpop.permute.xlu0 %199 }
  0xc0   :  { %v272_v63 = vpop.permute.xlu2 %271  ;;  %v203_v8 = vsel %vm103_vm2, %v200_v61, %v202_v60 }
  0xc1   :  { %v205_v13 = vadd.f32 %v203_v8, %v192_v9 }
  0xc6   :  { %v226_v3 = vpop.permute.xlu1 %225 }
  0xc7   :  { %v215_v4 = vpop.permute.xlu0 %214  ;;  %v229_v16 = vsel %vm131_vm4, %v226_v3, %v228_v6 }
  0xc8   :  { %v216_v10 = vsel %vm117_vm3, %v213_v49, %v215_v4  ;;  %v296_v12 = vpop.permute.xlu2 %295 }
  0xc9   :  { %v218_v15 = vadd.f32 %v216_v10, %v205_v13 }
  0xcb   :  { %v231_v18 = vadd.f32 %v229_v16, %v218_v15 }
  0xce   :  { %v241_v11 = vpop.permute.xlu1 %240 }
  0xcf   :  { %v239_v14 = vpop.permute.xlu0 %238 }
  0xd0   :  { %v242_v17 = vsel %vm145_vm5, %v239_v14, %v241_v11  ;;  %v311_v23 = vpop.permute.xlu2 %310 }
  0xd1   :  { %v244_v20 = vadd.f32 %v242_v17, %v231_v18 }
  0xd6   :  { %v270_v19 = vpop.permute.xlu1 %269 }
  0xd7   :  { %v254_v21 = vpop.permute.xlu0 %253  ;;  %v273_v42 = vsel %vm75_vm0, %v270_v19, %v272_v63 }
  0xd8   :  { %v255_v22 = vsel %vm159_vm6, %v252_v59, %v254_v21  ;;  %v366_v27 = vpop.permute.xlu2 %365  ;;  %v275_v45 = vadd.f32 %v273_v42, %v262_v40 }
  0xd9   :  { %v257_v24 = vadd.f32 %v255_v22, %v244_v20 }
  0xdb   :  { %259 = vst [vmem:[#allocation9 + $0x8] sm:$0xff] %v257_v24 }
  0xde   :  { %v285_v25 = vpop.permute.xlu1 %284 }
  0xdf   :  { %v283_v26 = vpop.permute.xlu0 %282 }
  0xe0   :  { %v381_v30 = vpop.permute.xlu2 %380  ;;  %v286_v44 = vsel %vm89_vm1, %v283_v26, %v285_v25 }
  0xe1   :  { %v288_v49 = vadd.f32 %v286_v44, %v275_v45 }
  0xe6   :  { %v309_v28 = vpop.permute.xlu1 %308 }
  0xe7   :  { %v298_v29 = vpop.permute.xlu0 %297  ;;  %v312_v55 = vsel %vm117_vm3, %v309_v28, %v311_v23 }
  0xe8   :  { %v405_v34 = vpop.permute.xlu2 %404  ;;  %v299_v48 = vsel %vm103_vm2, %v296_v12, %v298_v29 }
  0xe9   :  { %v301_v51 = vadd.f32 %v299_v48, %v288_v49 }
  0xeb   :  { %v314_v57 = vadd.f32 %v312_v55, %v301_v51 }
  0xee   :  { %v324_v31 = vpop.permute.xlu1 %323 }
  0xef   :  { %v322_v32 = vpop.permute.xlu0 %321 }
  0xf0   :  { %v420_v38 = vpop.permute.xlu2 %419  ;;  %v325_v56 = vsel %vm131_vm4, %v322_v32, %v324_v31 }
  0xf1   :  { %v327_v59 = vadd.f32 %v325_v56, %v314_v57 }
  0xf6   :  { %v379_v33 = vpop.permute.xlu1 %378 }
  0xf7   :  { %v368_v35 = vpop.permute.xlu0 %367  ;;  %v382_v60 = vsel %vm89_vm1, %v379_v33, %v381_v30 }
  0xf8   :  { %v431_v47 = vpop.permute.xlu2 %430  ;;  %v369_v52 = vsel %vm75_vm0, %v366_v27, %v368_v35 }
  0xf9   :  { %v371_v6 = vadd.f32 %v369_v52, %v358_v50 }
  0xfb   :  { %v384_v0 = vadd.f32 %v382_v60, %v371_v6 }
  0xfe   :  { %v394_v36 = vpop.permute.xlu1 %393 }
  0xff   :  { %v392_v37 = vpop.permute.xlu0 %391 }
 0x100   :  { %v395_v61 = vsel %vm103_vm2, %v392_v37, %v394_v36  ;;  %v350_v62 = vpop.permute.xlu2 %349 }
 0x101   :  { %v397_v3 = vadd.f32 %v395_v61, %v384_v0 }
 0x106   :  { %v418_v41 = vpop.permute.xlu1 %417 }
 0x107   :  { %v407_v43 = vpop.permute.xlu0 %406  ;;  %v421_v9 = vsel %vm131_vm4, %v418_v41, %v420_v38 }
 0x108   :  { %v408_v63 = vsel %vm117_vm3, %v405_v34, %v407_v43 }
 0x109   :  { %v410_v8 = vadd.f32 %v408_v63, %v397_v3 }
 0x10b   :  { %v423_v11 = vadd.f32 %v421_v9, %v410_v8 }
 0x10e   :  { %v337_v53 = vpop.permute.xlu1 %336 }
 0x10f   :  { %v335_v54 = vpop.permute.xlu0 %334 }
 0x110   :  { %v338_v58 = vsel %vm145_vm5, %v335_v54, %v337_v53 }
 0x111   :  { %v340_v1 = vadd.f32 %v338_v58, %v327_v59 }
 0x116   :  { %v348_v2 = vpop.permute.xlu1 %347 }
 0x117   :  { %v351_v4 = vsel %vm159_vm6, %v348_v2, %v350_v62  ;;  %v433_v5 = vpop.permute.xlu0 %432 }
 0x118   :  { %v353_v7 = vadd.f32 %v351_v4, %v340_v1  ;;  %v434_v10 = vsel %vm145_vm5, %v431_v47, %v433_v5 }
 0x119   :  { %v436_v13 = vadd.f32 %v434_v10, %v423_v11 }
 0x11a   :  { %355 = vst [vmem:[#allocation9 + $0x10] sm:$0xff] %v353_v7 }
 0x11e   :  { %v446_v12 = vpop.permute.xlu1 %445 }
 0x11f   :  { %v444_v14 = vpop.permute.xlu0 %443 }
 0x120   :  { %v447_v15 = vsel %vm159_vm6, %v444_v14, %v446_v12 }
 0x121   :  { %v449_v16 = vadd.f32 %v447_v15, %v436_v13 }
 0x123   :  { %451 = vst [vmem:[#allocation9 + $0x18] sm:$0xff] %v449_v16 }
 0x124   :  { %455 = vsyncadd [#allocation4], 384  ;;  %s468_s10 = sshll.u32 %s826_s3, 4  ;;  %s629_s11 = smov [#allocation9]   ;;  %s469_s10 = int_to_ptr.hbm [resolvable:$true] %s468_s10 }
 0x125   :  { %s466_s12 = sshll.u32 %s629_s11, 4  ;;  %s630_s13 = smov 128   ;;  %s467_s12 = int_to_ptr.vmem [resolvable:$true] %s466_s12 }
 0x126   :  { %475 = sst [smem:[#allocation11]] %s630_s13  ;;  %s631_s14 = smov 32  }
 0x127   :  { %477 = sst [smem:[#allocation11 + $0x1]] %s631_s14  ;;  %s632_s15 = smov 1  }
 0x128   :  { %479 = sst [smem:[#allocation11 + $0x2]] %s632_s15  ;;  %s633_s16 = smov 2  }
 0x129   :  { %481 = sst [smem:[#allocation11 + $0x3]] %s631_s14  ;;  %s634_s17 = smov [#allocation4]  }
 0x12a   :  { %483 = sst [smem:[#allocation11 + $0x4]] %s631_s14  ;;  %s635_s18 = smov [#allocation10]  }
 0x12b   :  { %485 = sst [smem:[#allocation11 + $0x5]] %s633_s16  ;;  %s636_s19 = smov 0  }
 0x12c   :  { %487 = dma.general %s467_s12, 128, %s469_s10, %s634_s17, %s635_s18, [#allocation11], %s636_s19, 0  }
 0x12d   :  { %614 = dma.done.wait [#allocation4], 512  }
 0x12e   :  { %615 = vsyncadd [#allocation4], 4294966784 }
 0x12f   :  { %492 = vsyncpa [#allocation3], 1 }
 0x130   :  { %493 = vsyncpa [#allocation8], 1 }
 0x131   :  { %494 = vsyncpa [#allocation4], 1 }
 0x132   :  { %495 = vsyncpa [#allocation5], 1 }

</bundles_post_ra>
